<compile_context>
chip_gen: v7x
topology: tpu7x:2x2x1
jax: 0.10.0
libtpu: 0.0.40
codegen_flags: <defaults>
</compile_context>

<pallas_src>
import jax
import jax.numpy as jnp
import numpy as np
from jax import lax
from jax.experimental import pallas as pl
from jax.experimental.pallas import tpu as pltpu


# Lane-tile for the fused (B * L_out) output axis.  Multiple of 128 (lane-dense
# vst on all generations); small enough that double-buffered f32 tiles fit
# comfortably inside v7x's 64 MiB physical VMEM.
_LANE_TILE = 512


def _grouped_matmul_bias_kernel(a_ref, w_ref, b_ref, o_ref):
    """One grid point = one (group, lane-tile).

    a_ref: (icg*K, TN)   tap-stacked input columns for this group / lane tile
    w_ref: (ocg, icg*K)  folded per-group weight slab (taps in contraction dim)
    b_ref: (ocg, 1)      per-group bias
    o_ref: (ocg, TN)     output tile (fused B*L_out lane axis)
    """
    acc = jnp.dot(w_ref[...], a_ref[...], preferred_element_type=jnp.float32)
    o_ref[...] = (acc + b_ref[...]).astype(o_ref.dtype)


def conv1d_pad(x, weight, bias, *, stride, groups, lane_tile=_LANE_TILE):
    """Pallas implementation of Conv1dPad.forward.

    x:      (B, C_in, L)              float32
    weight: (C_out, C_in//groups, K)  float32
    bias:   (C_out,)                  float32
    returns (B, C_out, ceil(L/stride)) float32
    """
    B, c_in, L = x.shape
    c_out, icg, K = weight.shape
    assert icg * groups == c_in, (icg, groups, c_in)
    assert c_out % groups == 0, (c_out, groups)
    ocg = c_out // groups

    # --- "same" padding exactly as the PyTorch module computes it -----------
    lout = (L + stride - 1) // stride
    p = max(0, (lout - 1) * stride + K - L)
    pad_left = p // 2
    pad_right = p - pad_left
    x_pad = jnp.pad(x, ((0, 0), (0, 0), (pad_left, pad_right)))

    # --- wrapper-side im2col: stack the K taps, fuse (B, lout) -> lane axis ---
    span = (lout - 1) * stride + 1
    taps = [x_pad[:, :, k:k + span:stride] for k in range(K)]   # each (B, C_in, lout)
    xt = jnp.stack(taps, axis=-2)                               # (B, C_in, K, lout)
    xt = xt.reshape(B, groups, icg, K, lout)
    xt = jnp.transpose(xt, (1, 2, 3, 0, 4))                     # (g, icg, K, B, lout)
    n_cols = B * lout
    a = xt.reshape(groups, icg * K, n_cols)                     # (g, icg*K, B*lout)

    # Lane tiling of the fused N = B*lout axis.  Always pad N to a multiple of
    # 128 so output stores are unmasked lane-dense vst; pad further to a tile
    # multiple when multiple tiles are needed so every grid block is full.
    n128 = ((n_cols + 127) // 128) * 128
    if n128 <= lane_tile:
        tn = n128
        n_pad = n128
    else:
        tn = lane_tile
        n_pad = ((n_cols + tn - 1) // tn) * tn
    if n_pad != n_cols:
        a = jnp.pad(a, ((0, 0), (0, 0), (0, n_pad - n_cols)))

    # Fold taps into the weight contraction dim: (g, ocg, icg*K), index i*K + k
    # matches the tap-stack ordering above.
    w2 = weight.reshape(groups, ocg, icg, K).reshape(groups, ocg, icg * K)
    b2 = bias.reshape(groups, ocg, 1)

    grid = (groups, n_pad // tn)

    flops = 2 * B * c_out * icg * K * lout
    bytes_accessed = 4 * (a.size + w2.size + b2.size + groups * ocg * n_pad)

    out = pl.pallas_call(
        _grouped_matmul_bias_kernel,
        out_shape=jax.ShapeDtypeStruct((groups, ocg, n_pad), x.dtype),
        grid=grid,
        in_specs=[
            # tap-stacked activations: new lane tile per inner grid step
            pl.BlockSpec((None, icg * K, tn), lambda g, j: (g, 0, j)),
            # per-group weight slab: constant across the inner (lane) axis,
            # so its block is not re-DMA'd across inner grid steps
            pl.BlockSpec((None, ocg, icg * K), lambda g, j: (g, 0, 0)),
            # per-group bias
            pl.BlockSpec((None, ocg, 1), lambda g, j: (g, 0, 0)),
        ],
        out_specs=pl.BlockSpec((None, ocg, tn), lambda g, j: (g, 0, j)),
        compiler_params=pltpu.CompilerParams(
            dimension_semantics=("parallel", "parallel"),
            vmem_limit_bytes=48 * 1024 * 1024,
        ),
        cost_estimate=pl.CostEstimate(
            flops=flops, transcendentals=0, bytes_accessed=bytes_accessed),
    )(a, w2, b2)

    # (groups, ocg, B*lout) -> (B, C_out, lout)
    y = out[:, :, :n_cols].reshape(groups, ocg, B, lout)
    y = jnp.transpose(y, (2, 0, 1, 3)).reshape(B, c_out, lout)
    return y


def _reference_conv1d_pad(x, weight, bias, *, stride, groups):
    """Pure-JAX reference mirroring the PyTorch module (for verification)."""
    L = x.shape[-1]
    K = weight.shape[-1]
    out_dim = (L + stride - 1) // stride
    p = max(0, (out_dim - 1) * stride + K - L)
    pad_left = p // 2
    pad_right = p - pad_left
    y = lax.conv_general_dilated(
        x, weight,
        window_strides=(stride,),
        padding=[(pad_left, pad_right)],
        dimension_numbers=('NCH', 'OIH', 'NCH'),
        feature_group_count=groups)
    return y + bias[None, :, None]


def _run_case(key, *, B, in_channels, out_channels, kernel_size, stride, groups, L):
    kx, kw, kb = jax.random.split(key, 3)
    x = jax.random.normal(kx, (B, in_channels, L), dtype=jnp.float32)
    fan_in = (in_channels // groups) * kernel_size
    bound = 1.0 / np.sqrt(fan_in)
    weight = jax.random.uniform(
        kw, (out_channels, in_channels // groups, kernel_size),
        minval=-bound, maxval=bound, dtype=jnp.float32)
    bias = jax.random.uniform(
        kb, (out_channels,), minval=-bound, maxval=bound, dtype=jnp.float32)

    out = conv1d_pad(x, weight, bias, stride=stride, groups=groups)
    out = jax.block_until_ready(out)

    ref = _reference_conv1d_pad(x, weight, bias, stride=stride, groups=groups)
    ref = jax.block_until_ready(ref)

    assert out.shape == ref.shape, (out.shape, ref.shape)
    np.testing.assert_allclose(np.asarray(out), np.asarray(ref),
                               rtol=2e-4, atol=2e-5)


if __name__ == "__main__":
    key = jax.random.PRNGKey(0)
    k1, k2 = jax.random.split(key)

    # Primary small config matching the module's typical use
    # (Conv1dPad(in_channels=4, out_channels=8, kernel_size=3, stride=2, groups=2)).
    _run_case(k1, B=2, in_channels=4, out_channels=8,
              kernel_size=3, stride=2, groups=2, L=16)

    # Second config that exercises multiple lane tiles + N-axis zero padding
    # (B*L_out = 1400 -> 3 tiles of 512).
    _run_case(k2, B=2, in_channels=8, out_channels=16,
              kernel_size=3, stride=1, groups=2, L=700)

    print("KERNEL_OK")
</pallas_src>

<mosaic_0001>
module attributes {stable_mosaic.version = 11 : i64} {
  func.func @_grouped_matmul_bias_kernel(%arg0: i32, %arg1: i32, %arg2: memref<1x6x128xf32, #tpu.memory_space<vmem>>, %arg3: memref<1x4x6xf32, #tpu.memory_space<vmem>>, %arg4: memref<1x4x1xf32, #tpu.memory_space<vmem>>, %arg5: memref<1x4x128xf32, #tpu.memory_space<vmem>>) attributes {dimension_semantics = [#tpu.dimension_semantics<parallel>, #tpu.dimension_semantics<parallel>], iteration_bounds = array<i64: 2, 1>, scalar_prefetch = 0 : i64, scratch_operands = 0 : i64, tpu.core_type = #tpu.core_type<tc>, window_params = [{transform_indices = @transform_0, window_bounds = array<i64: 1, 6, 128>}, {transform_indices = @transform_1, window_bounds = array<i64: 1, 4, 6>}, {transform_indices = @transform_2, window_bounds = array<i64: 1, 4, 1>}, {transform_indices = @transform_3, window_bounds = array<i64: 1, 4, 128>}]} {
    %c0 = arith.constant 0 : index
    %c0_0 = arith.constant 0 : index
    %c0_1 = arith.constant 0 : index
    %0 = vector.load %arg3[%c0, %c0_0, %c0_1] : memref<1x4x6xf32, #tpu.memory_space<vmem>>, vector<1x4x6xf32>
    %1 = vector.shape_cast %0 : vector<1x4x6xf32> to vector<4x6xf32>
    %c0_2 = arith.constant 0 : index
    %c0_3 = arith.constant 0 : index
    %c0_4 = arith.constant 0 : index
    %2 = vector.load %arg2[%c0_2, %c0_3, %c0_4] : memref<1x6x128xf32, #tpu.memory_space<vmem>>, vector<1x6x128xf32>
    %3 = vector.shape_cast %2 : vector<1x6x128xf32> to vector<6x128xf32>
    %cst = arith.constant dense<0.000000e+00> : vector<4x128xf32>
    %4 = tpu.matmul %1, %3, %cst {dimension_numbers = #tpu.dot_dimension_numbers<[1], [0], [0], [1], [0, 0, 1, 1], [], []>} : vector<4x6xf32>, vector<6x128xf32>, vector<4x128xf32> -> vector<4x128xf32>
    %c0_5 = arith.constant 0 : index
    %c0_6 = arith.constant 0 : index
    %c0_7 = arith.constant 0 : index
    %5 = vector.load %arg4[%c0_5, %c0_6, %c0_7] : memref<1x4x1xf32, #tpu.memory_space<vmem>>, vector<1x4x1xf32>
    %6 = vector.shape_cast %5 : vector<1x4x1xf32> to vector<4x1xf32>
    %7 = vector.broadcast %6 : vector<4x1xf32> to vector<4x128xf32>
    %8 = arith.addf %4, %7 : vector<4x128xf32>
    %c0_8 = arith.constant 0 : index
    %c0_9 = arith.constant 0 : index
    %c0_10 = arith.constant 0 : index
    %9 = vector.load %arg5[%c0_8, %c0_9, %c0_10] : memref<1x4x128xf32, #tpu.memory_space<vmem>>, vector<1x4x128xf32>
    %10 = vector.shape_cast %9 : vector<1x4x128xf32> to vector<4x128xf32>
    %11 = vector.shape_cast %8 : vector<4x128xf32> to vector<1x4x128xf32>
    tpu.vector_store %arg5[%c0_8, %c0_9, %c0_10], %11 {strides = array<i32>} : memref<1x4x128xf32, #tpu.memory_space<vmem>>, vector<1x4x128xf32>,
    return
  }
  func.func @transform_0(%arg0: i32, %arg1: i32) -> (i32, i32, i32) {
    %c0_i32 = arith.constant 0 : i32
    %c0_i32_0 = arith.constant 0 : i32
    return %arg0, %c0_i32, %arg1 : i32, i32, i32
  }
  func.func @transform_1(%arg0: i32, %arg1: i32) -> (i32, i32, i32) {
    %c0_i32 = arith.constant 0 : i32
    %c0_i32_0 = arith.constant 0 : i32
    %c0_i32_1 = arith.constant 0 : i32
    return %arg0, %c0_i32, %c0_i32_0 : i32, i32, i32
  }
  func.func @transform_2(%arg0: i32, %arg1: i32) -> (i32, i32, i32) {
    %c0_i32 = arith.constant 0 : i32
    %c0_i32_0 = arith.constant 0 : i32
    %c0_i32_1 = arith.constant 0 : i32
    return %arg0, %c0_i32, %c0_i32_0 : i32, i32, i32
  }
  func.func @transform_3(%arg0: i32, %arg1: i32) -> (i32, i32, i32) {
    %c0_i32 = arith.constant 0 : i32
    %c0_i32_0 = arith.constant 0 : i32
    return %arg0, %c0_i32, %arg1 : i32, i32, i32
  }
}

</mosaic_0001>

<bundles_post_ra>
// kernel: tpu_custom_call.1
= control target key start
LH: loop header
LB: loop body
LE: loop exit
PB: predicated region body
PF: predicated region fallthrough
CT: control target
= control target key end

     0   :  { %8 = vsyncpa [#allocation3], 0  ;;  %s725_s0 = inlined_call_operand.vmem [shape: f32[2,6,128], index: 0, kind: input, shape index: {}]   ;;  %s726_s1 = inlined_call_operand.vmem [shape: f32[2,4,6], index: 1, kind: input, shape index: {}]   ;;  %s727_s2 = inlined_call_operand.vmem [shape: f32[2,4,1], index: 2, kind: input, shape index: {}]   ;;  %s728_s3 = inlined_call_operand.hbm [shape: f32[2,4,128], index: 3, kind: output, shape index: {}]  }
   0x1   :  { %10 = vsyncpa [#allocation3 + $0x1], 0  ;;  %s607_s12 = smov 0   ;;  %s609_s13 = smov 0  }
   0x2   :  { %s611_s14 = smov 0   ;;  %s613_s15 = smov 0  }
   0x3   :  { %s615_s16 = smov 0   ;;  %s617_s17 = smov 0  }
   0x4 LB: > { %s422_s18 = sadd.s32 4294967295, %s581_s17   ;;  %s423_s19 = sadd.s32 4294967294, %s581_s17   ;;  %s581_s17 = sphi %s617_s17, %s16_s17   ;;  %s577_s16 = sphi %s615_s16, %s735_s16   ;;  %s573_s15 = sphi %s613_s15, %s734_s15   ;;  %s569_s14 = sphi %s611_s14, %s733_s14   ;;  %s565_s13 = sphi %s609_s13, %s732_s13   ;;  %s561_s12 = sphi %s607_s12, %s731_s12  }
   0x5   : > { %s28_s20 = sadd.s32 1, %s577_s16  ;;  %s117_s21 = sadd.s32 1, %s569_s14 }
   0x6   : > { %p30_p0 = scmp.ge.s32.totalorder %s28_s20, 2  ;;  %p127_p1 = scmp.ne.s32.totalorder %s569_s14, %s565_s13 }
   0x7   : > { %p128_p2 = scmp.eq.s32.totalorder %s422_s18, 1  ;;  %p133_p3 = scmp.ne.s32.totalorder %s565_s13, %s561_s12 }
   0x8   : > { %s737_s20 = smov (%p30_p0, %s28_s20), 0  ;;  %p134_p5 = scmp.eq.s32.totalorder %s423_s19, 1 }
   0x9   : > { %p647_p4 = por %p128_p2, %p127_p1  ;;  %s112_s23 = ssub.s32 %s577_s16, %s737_s20 }
   0xa   : > { %p426_p6 = scmp.ge.s32.totalorder %s581_s17, 1  ;;  %p115_p7 = scmp.eq.s32.totalorder %s112_s23, 0 }
   0xb   : > { %p654_p8 = por %p134_p5, %p133_p3  ;;  %p176_p9 = scmp.lt.s32.totalorder %s581_s17, 3 }
   0xc   : > { %s660_s25 = scalar_select %p115_p7, %s569_s14, %s117_s21  }
   0xd   : > { %p177_p10 = pnand %p426_p6, %p176_p9 }
   0xe   : > { %p210_p11 = scmp.lt.s32.totalorder (!%p177_p10), %s573_s15, 1  ;;  %v583_v0 = vmov (!%p177_p10), 0.0   ;;  %vm584_vm0 = vmmov (!%p177_p10), 0   ;;  %v585_v1 = vmov (!%p177_p10), 0   ;;  %vm237_vm1 = vcmask (!%p177_p10), 1045504   ;;  %s207_s11 = sand.u32 (!%p177_p10), 1, %s565_s13  }
   0xf   : > { %180 = sbr.rel (%p177_p10) target bundleno = 256 (0x100), region = 32  ;;  %439 = vmatprep.subr.mxu0 (!%p177_p10), %v583_v0  ;;  %441 = vmatprep.mubr.msk.f32.mxu0 (!%p177_p10), %vm584_vm0, %v583_v0  ;;  %vm233_vm2 = vcmask (!%p177_p10), 48128   ;;  %s427_s18 = sshll.u32 (!%p177_p10), %s207_s11, 2 }
  0x10   : > { %502 = vset.pattern.permute.xlu0 (!%p177_p10), %v585_v1  ;;  %s434_s19 = sshll.u32 (!%p177_p10), %s573_s15, 6  ;;  %s209_s21 = scalar_lea.vmem (!%p177_p10), [#allocation2], %s427_s18 }
  0x11   : > { %s327_s23 = sshll.u32 (!%p177_p10), %s209_s21, 4  ;;  %s678_s29 = scalar_lea.hbm (!%p177_p10), %s728_s3, %s434_s19  ;;  %s680_s23 = int_to_ptr.vmem [resolvable:$true] %s327_s23 }
  0x12   : > { %s503_s30 = scalar_lea.vmem (!%p177_p10), %s680_s23, 64 }
  0x13   : > { %p504_p12 = scmp.ne.s32.totalorder (!%p177_p10), %s680_s23, %s503_s30 }
  0x15   : > { %p505_p13 = pnand (!%p177_p10), %p504_p12, %p647_p4 }
  0x16   : > { %s211_s26 = scalar_select %p210_p11, %s573_s15, 1 }
  0x17   : > { %p506_p0 = pneg %p505_p13  ;;  %s586_s15 = smov [#allocation2]  }
  0x18   : > { %s428_s27 = sshll.u32 %s211_s26, 3  ;;  %s429_s28 = sshll.u32 %s211_s26, 2 }
  0x19   : > { %s216_s4 = scalar_lea.vmem %s725_s0, %s428_s27  ;;  %s220_s7 = scalar_lea.vmem %s726_s1, %s429_s28 }
  0x1a   : > { %v226_v2 = vld [vmem:[%s216_s4] sm:$0x3f]  ;;  %s224_s10 = scalar_lea.vmem %s727_s2, %s429_s28  ;;  %s313_s28 = scalar_lea.sflag [#allocation3], %s207_s11 }
  0x1b   : > { %v225_v3 = vld [vmem:[%s220_s7] sm:$0xf]  ;;  %440 = vmatpush3.msk.msra.mxu0 %vm237_vm1, %v226_v2  ;;  %s507_s4 = sshll.u32 %s586_s15, 4  ;;  %s508_s4 = int_to_ptr.vmem [resolvable:$false] %s507_s4 }
  0x1c   : > { %v227_v4 = vld [vmem:[%s224_s10] sm:$0xf]  ;;  %442 = vmatmul.mubr.msk.f32.vlgmr.msra.gmra.mrb[0].mxu0 %vm233_vm2, %v225_v3  ;;  %s509_s5 = scalar_lea.vmem %s508_s4, 128  ;;  %p510_p1 = scmp.lt.s32.totalorder %s680_s23, %s508_s4 }
  0x1d   : > { %230 = vperm.xlu0 %502, %v227_v4   ;;  %p511_p2 = scmp.lt.s32.totalorder %s509_s5, %s503_s30 }
  0x1f   : > { %p512_p3 = por %p511_p2, %p510_p1 }
  0x21   : > { %p513_p5 = pnand %p512_p3, %p506_p0 }
  0x9c   : > { %v231_v5 = vpop.permute.xlu0 %230 }
  0xef   : > { %v307_v6 = vpop.f32.mrb[0].mxu0 }
  0xf0   : > { %v308_v7 = vadd.f32 %v307_v6, %v231_v5  ;;  %v443_v8 = vpop.f32.mrb[1].mxu0 }
  0xf2   : > { %311 = vst [vmem:[%s209_s21] sm:$0xf] %v308_v7 }
  0xf3   : > { %516 = shalt.err (!%p513_p5)
}
  0xf4   : > { %s517_s6 = scalar_lea.hbm %s678_s29, 64  ;;  %s521_s9 = scalar_lea.hbm %s728_s3, 128 }
  0xf5   : > { %p518_p6 = scmp.ne.s32.totalorder %s678_s29, %s517_s6  ;;  %p522_p10 = scmp.lt.u32.totalorder %s678_s29, %s728_s3 }
  0xf6   : > { %p523_p11 = scmp.lt.u32.totalorder %s521_s9, %s517_s6  ;;  %p525_p13 = scmp.lt.u32.totalorder %s517_s6, %s678_s29 }
  0xf7   : > { %p519_p7 = pnand %p518_p6, %p647_p4 }
  0xf8   : > { %p524_p12 = por %p523_p11, %p522_p10 }
  0xf9   : > { %p520_p9 = pneg %p519_p7 }
  0xfa   : > { %p526_p0 = por %p525_p13, %p524_p12 }
  0xfc   : > { %p527_p1 = pnand %p526_p0, %p520_p9 }
  0xfe   : > { %530 = shalt.err (!%p527_p1)
}
  0xff   : > { %444 = dma.vmem_to_hbm [thread:$0]  (%p647_p4), %s680_s23, 64, %s678_s29, %s313_s28  }
 0x100 PF: > { %p450_p2 = scmp.ge.s32.totalorder %s581_s17, 2  ;;  %s339_s18 = sand.u32 1, %s561_s12  }
 0x101   : > { %s340_s19 = scalar_lea.sflag [#allocation3], %s339_s18 }
 0x102   : > { %p447_p3 = pnand %p450_p2, %p654_p8 }
 0x104   : > { %556 = dma.done.wait (!%p447_p3), %s340_s19, 64  }
 0x105   : > { %558 = vsyncadd (!%p447_p3), %s340_s19, 4294967232  ;;  %s16_s17 = sadd.s32 1, %s581_s17   ;;  %s731_s12 = smov %s565_s13 }
 0x106   : > { %p13_p5 = scmp.ge.s32.totalorder %s16_s17, 4   ;;  %s732_s13 = smov %s569_s14 }
 0x107   : > { %s733_s14 = smov %s660_s25  ;;  %s734_s15 = smov %s577_s16 }
 0x108   : > { %s735_s16 = smov %s737_s20  ;;  %15 = sbr.rel (!%p13_p5) target bundleno = 4 (0x4), region = 73 }
 0x10f   :  { %345 = vsyncpa [#allocation3], 1 }
 0x110   :  { %347 = vsyncpa [#allocation3 + $0x1], 1 }

</bundles_post_ra>
